<compile_context>
chip_gen: v7x
topology: tpu7x:2x2x1
jax: 0.10.0
libtpu: 0.0.40
codegen_flags: <defaults>
</compile_context>

<pallas_src>
import functools

import jax
import jax.numpy as jnp
from jax.experimental import pallas as pl
from jax.experimental.pallas import tpu as pltpu

OBS_DIM = 8        # env.observation_space.shape == (8,)
H1 = 120
H2 = 84
N_ACTIONS = 4      # env.action_space.n

LANE = 128         # TPU lane width; all feature dims are padded to this
DEFAULT_TB = 1024  # batch tile (rows per grid step)


def _round_up(x, m):
    return ((x + m - 1) // m) * m


def _qnet_kernel(x_ref, w1_ref, w2_ref, w3_ref, b_ref, out_ref):
    """One (TB, 8) batch tile -> (TB, 128) lane-dense Q slab (cols 0..3 valid)."""
    # Layer 1: Linear(8 -> 128padded) + ReLU      (MXU + VPU)
    h1 = jnp.dot(x_ref[...], w1_ref[...], preferred_element_type=jnp.float32)
    h1 = jnp.maximum(h1 + b_ref[0:1, :], 0.0)
    # Layer 2: Linear(128 -> 128padded) + ReLU
    h2 = jnp.dot(h1, w2_ref[...], preferred_element_type=jnp.float32)
    h2 = jnp.maximum(h2 + b_ref[1:2, :], 0.0)
    # Output layer: Linear(128 -> 128padded), no activation
    q = jnp.dot(h2, w3_ref[...], preferred_element_type=jnp.float32)
    out_ref[...] = (q + b_ref[2:3, :]).astype(out_ref.dtype)


@jax.jit
def qnetwork_forward(x, params):
    """x: (B, 8) float32.  params: zero-padded weights (in,128) and packed biases (8,128).

    Returns (B, 4) Q-values, identical to the PyTorch QNetwork forward.
    """
    w1, w2, w3, b_pack = params["w1"], params["w2"], params["w3"], params["b_pack"]
    B = x.shape[0]

    # Batch tile: multiple of 8 (sublane), capped at DEFAULT_TB.
    TB = min(DEFAULT_TB, _round_up(B, 8))
    B_pad = _round_up(B, TB)
    if B_pad != B:
        x = jnp.pad(x, ((0, B_pad - B), (0, 0)))

    resident = lambda shape: pl.BlockSpec(shape, lambda i: (0, 0))

    out_padded = pl.pallas_call(
        _qnet_kernel,
        out_shape=jax.ShapeDtypeStruct((B_pad, LANE), jnp.float32),
        grid=(B_pad // TB,),
        in_specs=[
            pl.BlockSpec((TB, OBS_DIM), lambda i: (i, 0)),   # x: tiled over batch
            resident((OBS_DIM, LANE)),                       # w1 (8,128)   VMEM-resident
            resident((LANE, LANE)),                          # w2 (128,128) VMEM-resident
            resident((LANE, LANE)),                          # w3 (128,128) VMEM-resident
            resident((8, LANE)),                             # packed biases (8,128)
        ],
        out_specs=pl.BlockSpec((TB, LANE), lambda i: (i, 0)),
        compiler_params=pltpu.CompilerParams(
            dimension_semantics=("parallel",),               # megacore split on v7x
            vmem_limit_bytes=32 * 1024 * 1024,
        ),
    )(x, w1, w2, w3, b_pack)

    # Drop batch padding and the padded (zero) action lanes.
    return out_padded[:B, :N_ACTIONS]


def init_params(key):
    """PyTorch nn.Linear default init U(-1/sqrt(fan_in), 1/sqrt(fan_in)),
    stored zero-padded to 128 lanes.  Padded lanes are exactly zero so the
    padded network computes the same function as the unpadded one."""
    keys = jax.random.split(key, 6)

    def linear(kw, kb, fan_in, fan_out):
        bound = 1.0 / jnp.sqrt(jnp.float32(fan_in))
        w = jax.random.uniform(kw, (fan_in, fan_out), jnp.float32, -bound, bound)
        b = jax.random.uniform(kb, (fan_out,), jnp.float32, -bound, bound)
        return w, b

    w1, b1 = linear(keys[0], keys[1], OBS_DIM, H1)      # (8,120), (120,)
    w2, b2 = linear(keys[2], keys[3], H1, H2)           # (120,84), (84,)
    w3, b3 = linear(keys[4], keys[5], H2, N_ACTIONS)    # (84,4),  (4,)

    # Zero-pad feature dims to 128 lanes.
    w1_p = jnp.zeros((OBS_DIM, LANE), jnp.float32).at[:, :H1].set(w1)
    w2_p = jnp.zeros((LANE, LANE), jnp.float32).at[:H1, :H2].set(w2)
    w3_p = jnp.zeros((LANE, LANE), jnp.float32).at[:H2, :N_ACTIONS].set(w3)

    # Pack the three biases into one (8,128) array: rows 0/1/2, rest zero.
    b_pack = jnp.zeros((8, LANE), jnp.float32)
    b_pack = b_pack.at[0, :H1].set(b1)
    b_pack = b_pack.at[1, :H2].set(b2)
    b_pack = b_pack.at[2, :N_ACTIONS].set(b3)

    return {"w1": w1_p, "w2": w2_p, "w3": w3_p, "b_pack": b_pack}


def _reference_forward(x, params):
    """Pure-JAX reference (padded lanes contribute exactly zero)."""
    h1 = jnp.maximum(x @ params["w1"] + params["b_pack"][0:1, :], 0.0)
    h2 = jnp.maximum(h1 @ params["w2"] + params["b_pack"][1:2, :], 0.0)
    q = h2 @ params["w3"] + params["b_pack"][2:3, :]
    return q[:, :N_ACTIONS]


if __name__ == "__main__":
    key = jax.random.PRNGKey(0)
    pkey, xkey1, xkey2 = jax.random.split(key, 3)

    params = init_params(pkey)

    # Acting-path sized batch (8 LunarLander-style 8-dim observations).
    x_small = jax.random.normal(xkey1, (8, OBS_DIM), dtype=jnp.float32)
    q_small = qnetwork_forward(x_small, params)
    jax.block_until_ready(q_small)
    assert q_small.shape == (8, N_ACTIONS)
    assert jnp.allclose(q_small, _reference_forward(x_small, params),
                        atol=1e-5, rtol=1e-5)

    # Non-multiple-of-8 batch exercises the batch-padding path.
    x_odd = jax.random.normal(xkey2, (50, OBS_DIM), dtype=jnp.float32)
    q_odd = qnetwork_forward(x_odd, params)
    jax.block_until_ready(q_odd)
    assert q_odd.shape == (50, N_ACTIONS)
    assert jnp.allclose(q_odd, _reference_forward(x_odd, params),
                        atol=1e-5, rtol=1e-5)

    print("KERNEL_OK")
</pallas_src>

<mosaic_0001>
module attributes {stable_mosaic.version = 11 : i64} {
  func.func @_qnet_kernel(%arg0: i32, %arg1: memref<8x8xf32, #tpu.memory_space<vmem>>, %arg2: memref<8x128xf32, #tpu.memory_space<vmem>>, %arg3: memref<128x128xf32, #tpu.memory_space<vmem>>, %arg4: memref<128x128xf32, #tpu.memory_space<vmem>>, %arg5: memref<8x128xf32, #tpu.memory_space<vmem>>, %arg6: memref<8x128xf32, #tpu.memory_space<vmem>>) attributes {dimension_semantics = [#tpu.dimension_semantics<parallel>], iteration_bounds = array<i64: 1>, scalar_prefetch = 0 : i64, scratch_operands = 0 : i64, tpu.core_type = #tpu.core_type<tc>, window_params = [{transform_indices = @transform_0, window_bounds = array<i64: 8, 8>}, {pipeline_mode = #tpu.pipeline_mode<synchronous>, transform_indices = @transform_1, window_bounds = array<i64: 8, 128>}, {pipeline_mode = #tpu.pipeline_mode<synchronous>, transform_indices = @transform_2, window_bounds = array<i64: 128, 128>}, {pipeline_mode = #tpu.pipeline_mode<synchronous>, transform_indices = @transform_3, window_bounds = array<i64: 128, 128>}, {pipeline_mode = #tpu.pipeline_mode<synchronous>, transform_indices = @transform_4, window_bounds = array<i64: 8, 128>}, {transform_indices = @transform_5, window_bounds = array<i64: 8, 128>}]} {
    %c0 = arith.constant 0 : index
    %c0_0 = arith.constant 0 : index
    %0 = vector.load %arg1[%c0, %c0_0] : memref<8x8xf32, #tpu.memory_space<vmem>>, vector<8x8xf32>
    %c0_1 = arith.constant 0 : index
    %c0_2 = arith.constant 0 : index
    %1 = vector.load %arg2[%c0_1, %c0_2] : memref<8x128xf32, #tpu.memory_space<vmem>>, vector<8x128xf32>
    %cst = arith.constant dense<0.000000e+00> : vector<8x128xf32>
    %2 = tpu.matmul %0, %1, %cst {dimension_numbers = #tpu.dot_dimension_numbers<[1], [0], [0], [1], [0, 0, 1, 1], [], []>} : vector<8x8xf32>, vector<8x128xf32>, vector<8x128xf32> -> vector<8x128xf32>
    %c0_3 = arith.constant 0 : index
    %c0_4 = arith.constant 0 : index
    %3 = vector.load %arg5[%c0_3, %c0_4] : memref<8x128xf32, #tpu.memory_space<vmem>>, vector<1x128xf32>
    %4 = vector.broadcast %3 : vector<1x128xf32> to vector<8x128xf32>
    %5 = arith.addf %2, %4 : vector<8x128xf32>
    %cst_5 = arith.constant 0.000000e+00 : f32
    %6 = vector.broadcast %cst_5 : f32 to vector<8x128xf32>
    %7 = arith.maximumf %5, %6 : vector<8x128xf32>
    %c0_6 = arith.constant 0 : index
    %c0_7 = arith.constant 0 : index
    %8 = vector.load %arg3[%c0_6, %c0_7] : memref<128x128xf32, #tpu.memory_space<vmem>>, vector<128x128xf32>
    %cst_8 = arith.constant dense<0.000000e+00> : vector<8x128xf32>
    %9 = tpu.matmul %7, %8, %cst_8 {dimension_numbers = #tpu.dot_dimension_numbers<[1], [0], [0], [1], [0, 0, 1, 1], [], []>} : vector<8x128xf32>, vector<128x128xf32>, vector<8x128xf32> -> vector<8x128xf32>
    %c1 = arith.constant 1 : index
    %c0_9 = arith.constant 0 : index
    %10 = vector.load %arg5[%c1, %c0_9] : memref<8x128xf32, #tpu.memory_space<vmem>>, vector<1x128xf32>
    %11 = vector.broadcast %10 : vector<1x128xf32> to vector<8x128xf32>
    %12 = arith.addf %9, %11 : vector<8x128xf32>
    %cst_10 = arith.constant 0.000000e+00 : f32
    %13 = vector.broadcast %cst_10 : f32 to vector<8x128xf32>
    %14 = arith.maximumf %12, %13 : vector<8x128xf32>
    %c0_11 = arith.constant 0 : index
    %c0_12 = arith.constant 0 : index
    %15 = vector.load %arg4[%c0_11, %c0_12] : memref<128x128xf32, #tpu.memory_space<vmem>>, vector<128x128xf32>
    %cst_13 = arith.constant dense<0.000000e+00> : vector<8x128xf32>
    %16 = tpu.matmul %14, %15, %cst_13 {dimension_numbers = #tpu.dot_dimension_numbers<[1], [0], [0], [1], [0, 0, 1, 1], [], []>} : vector<8x128xf32>, vector<128x128xf32>, vector<8x128xf32> -> vector<8x128xf32>
    %c2 = arith.constant 2 : index
    %c0_14 = arith.constant 0 : index
    %17 = vector.load %arg5[%c2, %c0_14] : memref<8x128xf32, #tpu.memory_space<vmem>>, vector<1x128xf32>
    %18 = vector.broadcast %17 : vector<1x128xf32> to vector<8x128xf32>
    %19 = arith.addf %16, %18 : vector<8x128xf32>
    %c0_15 = arith.constant 0 : index
    %c0_16 = arith.constant 0 : index
    %20 = vector.load %arg6[%c0_15, %c0_16] : memref<8x128xf32, #tpu.memory_space<vmem>>, vector<8x128xf32>
    tpu.vector_store %arg6[%c0_15, %c0_16], %19 {strides = array<i32>} : memref<8x128xf32, #tpu.memory_space<vmem>>, vector<8x128xf32>,
    return
  }
  func.func @transform_0(%arg0: i32) -> (i32, i32) {
    %c0_i32 = arith.constant 0 : i32
    %c0_i32_0 = arith.constant 0 : i32
    return %arg0, %c0_i32 : i32, i32
  }
  func.func @transform_1(%arg0: i32) -> (i32, i32) {
    %c0_i32 = arith.constant 0 : i32
    %c0_i32_0 = arith.constant 0 : i32
    %c0_i32_1 = arith.constant 0 : i32
    return %c0_i32, %c0_i32_0 : i32, i32
  }
  func.func @transform_2(%arg0: i32) -> (i32, i32) {
    %c0_i32 = arith.constant 0 : i32
    %c0_i32_0 = arith.constant 0 : i32
    %c0_i32_1 = arith.constant 0 : i32
    return %c0_i32, %c0_i32_0 : i32, i32
  }
  func.func @transform_3(%arg0: i32) -> (i32, i32) {
    %c0_i32 = arith.constant 0 : i32
    %c0_i32_0 = arith.constant 0 : i32
    %c0_i32_1 = arith.constant 0 : i32
    return %c0_i32, %c0_i32_0 : i32, i32
  }
  func.func @transform_4(%arg0: i32) -> (i32, i32) {
    %c0_i32 = arith.constant 0 : i32
    %c0_i32_0 = arith.constant 0 : i32
    %c0_i32_1 = arith.constant 0 : i32
    return %c0_i32, %c0_i32_0 : i32, i32
  }
  func.func @transform_5(%arg0: i32) -> (i32, i32) {
    %c0_i32 = arith.constant 0 : i32
    %c0_i32_0 = arith.constant 0 : i32
    return %arg0, %c0_i32 : i32, i32
  }
}

</mosaic_0001>

<bundles_post_ra>
// kernel: qnetwork_forward.1
= control target key start
LH: loop header
LB: loop body
LE: loop exit
PB: predicated region body
PF: predicated region fallthrough
CT: control target
= control target key end

     0   :  { %10 = vsyncpa [#allocation3], 0  ;;  %s772_s0 = inlined_call_operand.hbm [shape: f32[8,8], index: 0, kind: input, shape index: {}]   ;;  %s773_s1 = inlined_call_operand.hbm [shape: f32[8,128], index: 1, kind: input, shape index: {}]   ;;  %s774_s2 = inlined_call_operand.hbm [shape: f32[128,128], index: 2, kind: input, shape index: {}]   ;;  %s775_s3 = inlined_call_operand.hbm [shape: f32[128,128], index: 3, kind: input, shape index: {}]   ;;  %s776_s4 = inlined_call_operand.hbm [shape: f32[8,128], index: 4, kind: input, shape index: {}]   ;;  %s777_s5 = inlined_call_operand.vmem [shape: f32[8,128], index: 5, kind: output, shape index: {}]  }
   0x1   :  { %11 = vsyncpa [#allocation5], 0 }
   0x2   :  { %12 = vsyncpa [#allocation8], 0  ;;  %s644_s18 = smov [#allocation4]   ;;  %s528_s22 = scalar_lea.hbm %s773_s1, 128 }
   0x3   :  { %s29_s19 = sshll.u32 %s644_s18, 4  ;;  %p529_p0 = scmp.ne.s32.totalorder %s773_s1, %s528_s22  ;;  %s30_s19 = int_to_ptr.vmem [resolvable:$true] %s29_s19 }
   0x4   :  { %p532_p1 = scmp.lt.u32.totalorder %s528_s22, %s773_s1 }
   0x6   :  { %p534_p2 = pnand %p532_p1, %p529_p0 }
   0x8   :  { %537 = shalt.err (!%p534_p2)
}
   0x9   :  { %s538_s27 = scalar_lea.vmem %s30_s19, 128  ;;  %p543_p4 = scmp.lt.s32.totalorder %s30_s19, %s30_s19 }
   0xa   :  { %p539_p3 = scmp.ne.s32.totalorder %s30_s19, %s538_s27  ;;  %p544_p5 = scmp.lt.s32.totalorder %s538_s27, %s538_s27 }
   0xc   :  { %p545_p6 = por %p544_p5, %p543_p4 }
   0xe   :  { %p546_p7 = pnand %p545_p6, %p539_p3 }
  0x10   :  { %549 = shalt.err (!%p546_p7)
}
  0x11   :  { %32 = dma.hbm_to_vmem [thread:$0]  %s773_s1, 128, %s30_s19, [#allocation5]  }
  0x12   :  { %s645_s30 = smov [#allocation7]   ;;  %s646_s7 = smov [#allocation2]  }
  0x13   :  { %s50_s6 = sshll.u32 %s645_s30, 4  ;;  %s19_s8 = sshll.u32 %s646_s7, 4  ;;  %s51_s6 = int_to_ptr.vmem [resolvable:$true] %s50_s6  ;;  %s20_s8 = int_to_ptr.vmem [resolvable:$true] %s19_s8 }
  0x14   :  { %s550_s11 = scalar_lea.hbm %s775_s3, 2048 }
  0x15   :  { %p551_p8 = scmp.ne.s32.totalorder %s775_s3, %s550_s11  ;;  %p554_p9 = scmp.lt.u32.totalorder %s550_s11, %s775_s3 }
  0x17   :  { %p556_p10 = pnand %p554_p9, %p551_p8 }
  0x19   :  { %559 = shalt.err (!%p556_p10)
}
  0x1a   :  { %s560_s1 = scalar_lea.vmem %s51_s6, 2048  ;;  %p565_p12 = scmp.lt.s32.totalorder %s51_s6, %s51_s6 }
  0x1b   :  { %p561_p11 = scmp.ne.s32.totalorder %s51_s6, %s560_s1  ;;  %p566_p13 = scmp.lt.s32.totalorder %s560_s1, %s560_s1 }
  0x1d   :  { %p567_p0 = por %p566_p13, %p565_p12 }
  0x1f   :  { %p568_p1 = pnand %p567_p0, %p561_p11 }
  0x21   :  { %571 = shalt.err (!%p568_p1)
}
  0x22   :  { %s647_s16 = smov 128   ;;  %s648_s17 = smov 8  }
  0x23   :  { %56 = dma.hbm_to_vmem [thread:$0]  %s775_s3, 2048, %s51_s6, [#allocation8], %s647_s16, %s647_s16, %s648_s17  }
  0x24   :  { %s572_s22 = scalar_lea.hbm %s772_s0, 128 }
  0x25   :  { %p573_p2 = scmp.ne.s32.totalorder %s772_s0, %s572_s22  ;;  %p576_p3 = scmp.lt.u32.totalorder %s572_s22, %s772_s0 }
  0x27   :  { %p578_p4 = pnand %p576_p3, %p573_p2 }
  0x29   :  { %581 = shalt.err (!%p578_p4)
}
  0x2a   :  { %s582_s27 = scalar_lea.vmem %s20_s8, 128  ;;  %p587_p6 = scmp.lt.s32.totalorder %s20_s8, %s20_s8 }
  0x2b   :  { %p583_p5 = scmp.ne.s32.totalorder %s20_s8, %s582_s27  ;;  %p588_p7 = scmp.lt.s32.totalorder %s582_s27, %s582_s27 }
  0x2d   :  { %p589_p8 = por %p588_p7, %p587_p6 }
  0x2f   :  { %p590_p9 = pnand %p589_p8, %p583_p5 }
  0x31   :  { %593 = shalt.err (!%p590_p9)
}
  0x32   :  { %22 = dma.hbm_to_vmem [thread:$0]  %s772_s0, 128, %s20_s8, [#allocation3]  }
  0x33   :  { %s649_s29 = smov [#allocation6]   ;;  %s650_s6 = smov [#allocation9]  }
  0x34   :  { %s38_s30 = sshll.u32 %s649_s29, 4  ;;  %s63_s7 = sshll.u32 %s650_s6, 4  ;;  %s39_s30 = int_to_ptr.vmem [resolvable:$true] %s38_s30  ;;  %s64_s7 = int_to_ptr.vmem [resolvable:$true] %s63_s7 }
  0x35   :  { %s594_s11 = scalar_lea.hbm %s774_s2, 2048 }
  0x36   :  { %p595_p10 = scmp.ne.s32.totalorder %s774_s2, %s594_s11  ;;  %p598_p11 = scmp.lt.u32.totalorder %s594_s11, %s774_s2 }
  0x38   :  { %p600_p12 = pnand %p598_p11, %p595_p10 }
  0x3a   :  { %603 = shalt.err (!%p600_p12)
}
  0x3b   :  { %s604_s0 = scalar_lea.vmem %s39_s30, 2048  ;;  %p609_p0 = scmp.lt.s32.totalorder %s39_s30, %s39_s30 }
  0x3c   :  { %p605_p13 = scmp.ne.s32.totalorder %s39_s30, %s604_s0  ;;  %p610_p1 = scmp.lt.s32.totalorder %s604_s0, %s604_s0 }
  0x3e   :  { %p611_p2 = por %p610_p1, %p609_p0 }
  0x40   :  { %p612_p3 = pnand %p611_p2, %p605_p13 }
  0x42   :  { %615 = shalt.err (!%p612_p3)
}
  0x43   :  { %44 = dma.hbm_to_vmem [thread:$0]  %s774_s2, 2048, %s39_s30, [#allocation5], %s647_s16, %s647_s16, %s648_s17  }
  0x44   :  { %s616_s20 = scalar_lea.hbm %s776_s4, 128 }
  0x45   :  { %p617_p4 = scmp.ne.s32.totalorder %s776_s4, %s616_s20  ;;  %p620_p5 = scmp.lt.u32.totalorder %s616_s20, %s776_s4 }
  0x47   :  { %p622_p6 = pnand %p620_p5, %p617_p4 }
  0x49   :  { %625 = shalt.err (!%p622_p6)
}
  0x4a   :  { %s626_s25 = scalar_lea.vmem %s64_s7, 128  ;;  %p631_p8 = scmp.lt.s32.totalorder %s64_s7, %s64_s7 }
  0x4b   :  { %p627_p7 = scmp.ne.s32.totalorder %s64_s7, %s626_s25  ;;  %p632_p9 = scmp.lt.s32.totalorder %s626_s25, %s626_s25 }
  0x4d   :  { %p633_p10 = por %p632_p9, %p631_p8 }
  0x4f   :  { %p634_p11 = pnand %p633_p10, %p627_p7 }
  0x51   :  { %637 = shalt.err (!%p634_p11)
}
  0x52   :  { %66 = dma.hbm_to_vmem [thread:$0]  %s776_s4, 128, %s64_s7, [#allocation8]  }
  0x53   :  { %638 = dma.done.wait [#allocation3], 128  }
  0x54   :  { %639 = vsyncadd [#allocation3], 4294967168 }
  0x55   :  { %640 = dma.done.wait [#allocation5], 2176  }
  0x56   :  { %641 = vsyncadd [#allocation5], 4294965120 }
  0x57   :  { %642 = dma.done.wait [#allocation8], 2176  }
  0x58   :  { %643 = vsyncadd [#allocation8], 4294965120  ;;  %v651_v0 = vmov 0.0   ;;  %vm652_vm0 = vmmov 0   ;;  %v653_v1 = vmov 0.0|0.0   ;;  %vm89_vm1 = vcmask 64512  }
  0x59   :  { %395 = vmatprep.subr.mxu0 %v651_v0  ;;  %397 = vmatprep.mubr.msk.f32.mxu0 %vm652_vm0, %v651_v0  ;;  %v83_v2 = vld [vmem:[#allocation4] sm:$0xff]  ;;  %v82_v3 = vld [vmem:[#allocation2] sm:$0xff]  ;;  %v164_v4 = vld [vmem:[#allocation6] sm:$0xff] }
  0x5a   :  { %470 = vmatprep.subr.bf16.mxu1 %v653_v1  ;;  %432 = vmatprep.mubr.msk.f32.mxu1 %vm652_vm0, %v651_v0  ;;  %v165_v5 = vld [vmem:[#allocation6 + $0x8] sm:$0xff]  ;;  %v166_v6 = vld [vmem:[#allocation6 + $0x10] sm:$0xff]  ;;  %v167_v7 = vld [vmem:[#allocation6 + $0x18] sm:$0xff] }
  0x5b   :  { %396 = vmatpush3.msra.mxu0 %v83_v2  ;;  %v471_v8 = vpack.c.bf16 %v165_v5, %v164_v4  ;;  %v474_v9 = vpack.c.bf16 %v167_v7, %v166_v6  ;;  %v168_v10 = vld [vmem:[#allocation6 + $0x20] sm:$0xff]  ;;  %v169_v11 = vld [vmem:[#allocation6 + $0x28] sm:$0xff]  ;;  %v170_v13 = vld [vmem:[#allocation6 + $0x30] sm:$0xff] }
  0x5c   :  { %398 = vmatmul.mubr.msk.f32.vlgmr.msra.gmra.mrb[0].mxu0 %vm89_vm1, %v82_v3  ;;  %494 = vmatprep.subr.bf16.mxu0 %v653_v1  ;;  %v477_v12 = vpack.c.bf16 %v169_v11, %v168_v10  ;;  %v171_v14 = vld [vmem:[#allocation6 + $0x38] sm:$0xff]  ;;  %v172_v16 = vld [vmem:[#allocation6 + $0x40] sm:$0xff]  ;;  %v173_v17 = vld [vmem:[#allocation6 + $0x48] sm:$0xff] }
  0x5d   :  { %467 = vmatprep.mubr.msk.f32.mxu0 %vm652_vm0, %v651_v0  ;;  %472 = vmatpush3.bf16.msra.mxu1 %v471_v8  ;;  %v480_v15 = vpack.c.bf16 %v171_v14, %v170_v13  ;;  %v483_v18 = vpack.c.bf16 %v173_v17, %v172_v16  ;;  %v174_v19 = vld [vmem:[#allocation6 + $0x50] sm:$0xff]  ;;  %v175_v20 = vld [vmem:[#allocation6 + $0x58] sm:$0xff]  ;;  %v176_v22 = vld [vmem:[#allocation6 + $0x60] sm:$0xff] }
  0x5e   :  { %473 = vmatprep.subr.bf16.mxu1 %v653_v1  ;;  %v486_v21 = vpack.c.bf16 %v175_v20, %v174_v19  ;;  %v177_v23 = vld [vmem:[#allocation6 + $0x68] sm:$0xff]  ;;  %v178_v25 = vld [vmem:[#allocation6 + $0x70] sm:$0xff]  ;;  %v179_v26 = vld [vmem:[#allocation6 + $0x78] sm:$0xff] }
  0x5f   :  { %v489_v24 = vpack.c.bf16 %v177_v23, %v176_v22  ;;  %v492_v27 = vpack.c.bf16 %v179_v26, %v178_v25  ;;  %v256_v28 = vld [vmem:[#allocation7] sm:$0xff]  ;;  %v257_v29 = vld [vmem:[#allocation7 + $0x8] sm:$0xff]  ;;  %v258_v30 = vld [vmem:[#allocation7 + $0x10] sm:$0xff] }
  0x60   :  { %v495_v31 = vpack.c.bf16 %v257_v29, %v256_v28  ;;  %v259_v32 = vld [vmem:[#allocation7 + $0x18] sm:$0xff]  ;;  %v260_v34 = vld [vmem:[#allocation7 + $0x20] sm:$0xff]  ;;  %v261_v35 = vld [vmem:[#allocation7 + $0x28] sm:$0xff] }
  0x61   :  { %475 = vmatpush3.bf16.msra.mxu1 %v474_v9  ;;  %v498_v33 = vpack.c.bf16 %v259_v32, %v258_v30  ;;  %v501_v36 = vpack.c.bf16 %v261_v35, %v260_v34  ;;  %v262_v37 = vld [vmem:[#allocation7 + $0x30] sm:$0xff]  ;;  %v263_v38 = vld [vmem:[#allocation7 + $0x38] sm:$0xff]  ;;  %v264_v40 = vld [vmem:[#allocation7 + $0x40] sm:$0xff] }
  0x62   :  { %476 = vmatprep.subr.bf16.mxu1 %v653_v1  ;;  %496 = vmatpush3.bf16.msra.mxu0 %v495_v31  ;;  %v504_v39 = vpack.c.bf16 %v263_v38, %v262_v37  ;;  %v265_v41 = vld [vmem:[#allocation7 + $0x48] sm:$0xff]  ;;  %v266_v43 = vld [vmem:[#allocation7 + $0x50] sm:$0xff]  ;;  %v267_v44 = vld [vmem:[#allocation7 + $0x58] sm:$0xff] }
  0x63   :  { %497 = vmatprep.subr.bf16.mxu0 %v653_v1  ;;  %v507_v42 = vpack.c.bf16 %v265_v41, %v264_v40  ;;  %v510_v45 = vpack.c.bf16 %v267_v44, %v266_v43  ;;  %v268_v46 = vld [vmem:[#allocation7 + $0x60] sm:$0xff]  ;;  %v269_v47 = vld [vmem:[#allocation7 + $0x68] sm:$0xff]  ;;  %v270_v54 = vld [vmem:[#allocation7 + $0x70] sm:$0xff] }
  0x64   :  { %v513_v48 = vpack.c.bf16 %v269_v47, %v268_v46  ;;  %v355_v49 = vld [vmem:[#allocation9] ss:$0 sm:$0xff]  ;;  %v271_v55 = vld [vmem:[#allocation7 + $0x78] sm:$0xff]  ;;  %v357_v57 = vld [vmem:[#allocation9 + $0x1] ss:$0 sm:$0xff] }
  0x65   :  { %478 = vmatpush3.bf16.msra.mxu1 %v477_v12  ;;  %v516_v56 = vpack.c.bf16 %v271_v55, %v270_v54  ;;  %v358_v62 = vld [vmem:[#allocation9 + $0x2] ss:$0 sm:$0xff] }
  0x66   :  { %479 = vmatprep.subr.bf16.mxu1 %v653_v1  ;;  %499 = vmatpush3.bf16.msra.mxu0 %v498_v33 }
  0x67   :  { %500 = vmatprep.subr.bf16.mxu0 %v653_v1 }
  0x69   :  { %481 = vmatpush3.bf16.msra.mxu1 %v480_v15 }
  0x6a   :  { %482 = vmatprep.subr.bf16.mxu1 %v653_v1  ;;  %502 = vmatpush3.bf16.msra.mxu0 %v501_v36 }
  0x6b   :  { %503 = vmatprep.subr.bf16.mxu0 %v653_v1 }
  0x6d   :  { %484 = vmatpush3.bf16.msra.mxu1 %v483_v18 }
  0x6e   :  { %485 = vmatprep.subr.bf16.mxu1 %v653_v1  ;;  %505 = vmatpush3.bf16.msra.mxu0 %v504_v39 }
  0x6f   :  { %506 = vmatprep.subr.bf16.mxu0 %v653_v1 }
  0x71   :  { %487 = vmatpush3.bf16.msra.mxu1 %v486_v21 }
  0x72   :  { %488 = vmatprep.subr.bf16.mxu1 %v653_v1  ;;  %508 = vmatpush3.bf16.msra.mxu0 %v507_v42 }
  0x73   :  { %509 = vmatprep.subr.bf16.mxu0 %v653_v1 }
  0x75   :  { %490 = vmatpush3.bf16.msra.mxu1 %v489_v24 }
  0x76   :  { %491 = vmatprep.subr.bf16.mxu1 %v653_v1  ;;  %511 = vmatpush3.bf16.msra.mxu0 %v510_v45 }
  0x77   :  { %512 = vmatprep.subr.bf16.mxu0 %v653_v1 }
  0x79   :  { %493 = vmatpush3.bf16.msra.mxu1 %v492_v27 }
  0x7a   :  { %514 = vmatpush3.bf16.msra.mxu0 %v513_v48 }
  0x7b   :  { %515 = vmatprep.subr.bf16.mxu0 %v653_v1 }
  0x7e   :  { %517 = vmatpush3.bf16.msra.mxu0 %v516_v56 }
 0x12f   :  { %v159_v50 = vpop.f32.mrb[0].mxu0 }
 0x130   :  { %v160_v51 = vadd.f32 %v355_v49, %v159_v50  ;;  %v399_v52 = vpop.f32.mrb[1].mxu0 }
 0x132   :  { %v163_v53 = vmax.f32 %v160_v51, 0.0 }
 0x134   :  { %433 = vmatmul.mubr.f32.vlgmr.msra.gmra.mrb[0].mxu1 %v163_v53 }
 0x207   :  { %v251_v58 = vpop.f32.mrb[0].mxu1 }
 0x208   :  { %v252_v59 = vadd.f32 %v357_v57, %v251_v58  ;;  %v434_v60 = vpop.f32.mrb[1].mxu1 }
 0x20a   :  { %v255_v61 = vmax.f32 %v252_v59, 0.0 }
 0x20c   :  { %468 = vmatmul.mubr.f32.vlgmr.msra.gmra.mrb[2].mxu0 %v255_v61 }
 0x2df   :  { %v343_v63 = vpop.f32.mrb[2].mxu0 }
 0x2e0   :  { %v344_v0 = vadd.f32 %v358_v62, %v343_v63  ;;  %v469_v1 = vpop.f32.mrb[3].mxu0 }
 0x2e2   :  { %347 = vst [vmem:[%s777_s5] sm:$0xff] %v344_v0 }
 0x2e3   :  { %352 = vsyncpa [#allocation3], 1 }
 0x2e4   :  { %353 = vsyncpa [#allocation5], 1 }
 0x2e5   :  { %354 = vsyncpa [#allocation8], 1 }

</bundles_post_ra>
